<compile_context>
chip_gen: v6e
topology: v6e:2x2x1
jax: 0.10.0
libtpu: 0.0.40
codegen_flags: <defaults>
</compile_context>

<pallas_src>
import jax
import jax.numpy as jnp
from jax.experimental import pallas as pl
from jax.experimental.pallas import tpu as pltpu


def sum_fusion_kernel(x_ref, y_ref, wx_ref, wy_ref, b_ref, out_ref):
    """out = x @ Wx + y @ Wy + (b_x + b_y), all in VMEM, f32 accumulation."""
    acc = jnp.dot(x_ref[...], wx_ref[...],
                  preferred_element_type=jnp.float32)
    acc = acc + jnp.dot(y_ref[...], wy_ref[...],
                        preferred_element_type=jnp.float32)
    out_ref[...] = (acc + b_ref[...]).astype(out_ref.dtype)


def sum_normal_fusion(x, y, params, *, block_b=512):
    """JAX wrapper mirroring Sum_normal_Fusion.forward.

    params:
      w_x : (input_dim, output_dim)   (transposed vs. PyTorch layout)
      b_x : (output_dim,)
      w_y : (input_dim, output_dim)
      b_y : (output_dim,)
    Returns (x, y, output).
    """
    w_x, b_x, w_y, b_y = params["w_x"], params["b_x"], params["w_y"], params["b_y"]

    B, input_dim = x.shape
    output_dim = w_x.shape[1]
    assert y.shape == (B, input_dim)
    assert w_y.shape == (input_dim, output_dim)

    # Fuse the two bias adds into one broadcast add (precompute once).
    bias = (b_x + b_y).reshape(1, output_dim).astype(jnp.float32)

    # Batch tile: full batch if small, else 512-row tiles (multiple of 8).
    tb = B if B <= block_b else block_b
    grid = (pl.cdiv(B, tb),)

    itemsize = jnp.dtype(jnp.float32).itemsize
    cost = pl.CostEstimate(
        flops=2 * B * input_dim * output_dim * 2,      # two matmuls
        transcendentals=0,
        bytes_accessed=itemsize * (2 * B * input_dim          # x, y
                                   + 2 * input_dim * output_dim  # Wx, Wy
                                   + output_dim                  # bias
                                   + B * output_dim),            # out
    )

    out = pl.pallas_call(
        sum_fusion_kernel,
        out_shape=jax.ShapeDtypeStruct((B, output_dim), jnp.float32),
        grid=grid,
        in_specs=[
            pl.BlockSpec((tb, input_dim), lambda i: (i, 0)),          # x tile
            pl.BlockSpec((tb, input_dim), lambda i: (i, 0)),          # y tile
            pl.BlockSpec((input_dim, output_dim), lambda i: (0, 0)),  # Wx (resident)
            pl.BlockSpec((input_dim, output_dim), lambda i: (0, 0)),  # Wy (resident)
            pl.BlockSpec((1, output_dim), lambda i: (0, 0)),          # fused bias
        ],
        out_specs=pl.BlockSpec((tb, output_dim), lambda i: (i, 0)),
        compiler_params=pltpu.CompilerParams(
            dimension_semantics=("parallel",)),
        cost_estimate=cost,
    )(x, y, w_x, w_y, bias)

    return (x, y, out)


def init_params(key, input_dim, output_dim):
    """Deterministic synthetic parameters (uniform, like torch Linear default)."""
    k1, k2, k3, k4 = jax.random.split(key, 4)
    lim = 1.0 / jnp.sqrt(input_dim)
    return {
        # stored as (in_features, out_features) — transpose of PyTorch layout
        "w_x": jax.random.uniform(k1, (input_dim, output_dim), jnp.float32, -lim, lim),
        "b_x": jax.random.uniform(k2, (output_dim,), jnp.float32, -lim, lim),
        "w_y": jax.random.uniform(k3, (input_dim, output_dim), jnp.float32, -lim, lim),
        "b_y": jax.random.uniform(k4, (output_dim,), jnp.float32, -lim, lim),
    }


def reference(x, y, params):
    """Pure-JAX reference of the PyTorch forward for a correctness check."""
    out = (x @ params["w_x"] + params["b_x"]) + (y @ params["w_y"] + params["b_y"])
    return (x, y, out)


if __name__ == "__main__":
    B, INPUT_DIM, OUTPUT_DIM = 8, 32, 16

    key = jax.random.PRNGKey(0)
    kx, ky, kp = jax.random.split(key, 3)
    x = jax.random.normal(kx, (B, INPUT_DIM), jnp.float32)
    y = jax.random.normal(ky, (B, INPUT_DIM), jnp.float32)
    params = init_params(kp, INPUT_DIM, OUTPUT_DIM)

    x_out, y_out, out = sum_normal_fusion(x, y, params)
    jax.block_until_ready(out)

    _, _, out_ref = reference(x, y, params)
    assert jnp.allclose(out, out_ref, atol=1e-4, rtol=1e-4), "mismatch vs reference"
    assert x_out is x and y_out is y  # passthrough outputs

    print("KERNEL_OK")
</pallas_src>

<mosaic_0001>
module attributes {stable_mosaic.version = 11 : i64} {
  func.func @sum_fusion_kernel(%arg0: i32, %arg1: memref<8x32xf32, #tpu.memory_space<vmem>>, %arg2: memref<8x32xf32, #tpu.memory_space<vmem>>, %arg3: memref<32x16xf32, #tpu.memory_space<vmem>>, %arg4: memref<32x16xf32, #tpu.memory_space<vmem>>, %arg5: memref<1x16xf32, #tpu.memory_space<vmem>>, %arg6: memref<8x16xf32, #tpu.memory_space<vmem>>) attributes {dimension_semantics = [#tpu.dimension_semantics<parallel>], iteration_bounds = array<i64: 1>, scalar_prefetch = 0 : i64, scratch_operands = 0 : i64, tpu.core_type = #tpu.core_type<tc>, window_params = [{transform_indices = @transform_0, window_bounds = array<i64: 8, 32>}, {transform_indices = @transform_1, window_bounds = array<i64: 8, 32>}, {pipeline_mode = #tpu.pipeline_mode<synchronous>, transform_indices = @transform_2, window_bounds = array<i64: 32, 16>}, {pipeline_mode = #tpu.pipeline_mode<synchronous>, transform_indices = @transform_3, window_bounds = array<i64: 32, 16>}, {pipeline_mode = #tpu.pipeline_mode<synchronous>, transform_indices = @transform_4, window_bounds = array<i64: 1, 16>}, {transform_indices = @transform_5, window_bounds = array<i64: 8, 16>}]} {
    %c0 = arith.constant 0 : index
    %c0_0 = arith.constant 0 : index
    %0 = vector.load %arg1[%c0, %c0_0] : memref<8x32xf32, #tpu.memory_space<vmem>>, vector<8x32xf32>
    %c0_1 = arith.constant 0 : index
    %c0_2 = arith.constant 0 : index
    %1 = vector.load %arg3[%c0_1, %c0_2] : memref<32x16xf32, #tpu.memory_space<vmem>>, vector<32x16xf32>
    %cst = arith.constant dense<0.000000e+00> : vector<8x16xf32>
    %2 = tpu.matmul %0, %1, %cst {dimension_numbers = #tpu.dot_dimension_numbers<[1], [0], [0], [1], [0, 0, 1, 1], [], []>} : vector<8x32xf32>, vector<32x16xf32>, vector<8x16xf32> -> vector<8x16xf32>
    %c0_3 = arith.constant 0 : index
    %c0_4 = arith.constant 0 : index
    %3 = vector.load %arg2[%c0_3, %c0_4] : memref<8x32xf32, #tpu.memory_space<vmem>>, vector<8x32xf32>
    %c0_5 = arith.constant 0 : index
    %c0_6 = arith.constant 0 : index
    %4 = vector.load %arg4[%c0_5, %c0_6] : memref<32x16xf32, #tpu.memory_space<vmem>>, vector<32x16xf32>
    %cst_7 = arith.constant dense<0.000000e+00> : vector<8x16xf32>
    %5 = tpu.matmul %3, %4, %cst_7 {dimension_numbers = #tpu.dot_dimension_numbers<[1], [0], [0], [1], [0, 0, 1, 1], [], []>} : vector<8x32xf32>, vector<32x16xf32>, vector<8x16xf32> -> vector<8x16xf32>
    %6 = arith.addf %2, %5 : vector<8x16xf32>
    %c0_8 = arith.constant 0 : index
    %c0_9 = arith.constant 0 : index
    %7 = vector.load %arg5[%c0_8, %c0_9] : memref<1x16xf32, #tpu.memory_space<vmem>>, vector<1x16xf32>
    %8 = vector.broadcast %7 : vector<1x16xf32> to vector<8x16xf32>
    %9 = arith.addf %6, %8 : vector<8x16xf32>
    %c0_10 = arith.constant 0 : index
    %c0_11 = arith.constant 0 : index
    %10 = vector.load %arg6[%c0_10, %c0_11] : memref<8x16xf32, #tpu.memory_space<vmem>>, vector<8x16xf32>
    tpu.vector_store %arg6[%c0_10, %c0_11], %9 {strides = array<i32>} : memref<8x16xf32, #tpu.memory_space<vmem>>, vector<8x16xf32>,
    return
  }
  func.func @transform_0(%arg0: i32) -> (i32, i32) {
    %c0_i32 = arith.constant 0 : i32
    %c0_i32_0 = arith.constant 0 : i32
    return %arg0, %c0_i32 : i32, i32
  }
  func.func @transform_1(%arg0: i32) -> (i32, i32) {
    %c0_i32 = arith.constant 0 : i32
    %c0_i32_0 = arith.constant 0 : i32
    return %arg0, %c0_i32 : i32, i32
  }
  func.func @transform_2(%arg0: i32) -> (i32, i32) {
    %c0_i32 = arith.constant 0 : i32
    %c0_i32_0 = arith.constant 0 : i32
    %c0_i32_1 = arith.constant 0 : i32
    return %c0_i32, %c0_i32_0 : i32, i32
  }
  func.func @transform_3(%arg0: i32) -> (i32, i32) {
    %c0_i32 = arith.constant 0 : i32
    %c0_i32_0 = arith.constant 0 : i32
    %c0_i32_1 = arith.constant 0 : i32
    return %c0_i32, %c0_i32_0 : i32, i32
  }
  func.func @transform_4(%arg0: i32) -> (i32, i32) {
    %c0_i32 = arith.constant 0 : i32
    %c0_i32_0 = arith.constant 0 : i32
    %c0_i32_1 = arith.constant 0 : i32
    return %c0_i32, %c0_i32_0 : i32, i32
  }
  func.func @transform_5(%arg0: i32) -> (i32, i32) {
    %c0_i32 = arith.constant 0 : i32
    %c0_i32_0 = arith.constant 0 : i32
    return %arg0, %c0_i32 : i32, i32
  }
}

</mosaic_0001>

<bundles_post_ra>
// kernel: tpu_custom_call.1
= control target key start
LH: loop header
LB: loop body
LE: loop exit
PB: predicated region body
PF: predicated region fallthrough
CT: control target
= control target key end

     0   :  { %v262_v2 = vmov 0.0   ;;  %s331_s0 = inlined_call_operand.vmem [shape: f32[8,32], index: 0, kind: input, shape index: {}]   ;;  %s332_s1 = inlined_call_operand.vmem [shape: f32[8,32], index: 1, kind: input, shape index: {}]   ;;  %s333_s2 = inlined_call_operand.vmem [shape: f32[32,16], index: 2, kind: input, shape index: {}]   ;;  %s334_s3 = inlined_call_operand.vmem [shape: f32[32,16], index: 3, kind: input, shape index: {}]   ;;  %s335_s4 = inlined_call_operand.vmem [shape: f32[1,16], index: 4, kind: input, shape index: {}]   ;;  %s336_s5 = inlined_call_operand.hbm [shape: f32[8,16], index: 5, kind: output, shape index: {}]  }
   0x1   :  { %v30_v0 = vld [vmem:[%s334_s3 + $0x18] sm:$0xff]  ;;  %215 = vmatprep.subr.mxu0 %v262_v2  ;;  %226 = vmatprep.subr.mxu1 %v262_v2  ;;  %v29_v3 = vld [vmem:[%s334_s3 + $0x10] sm:$0xff]  ;;  %v28_v5 = vld [vmem:[%s334_s3 + $0x8] sm:$0xff] }
   0x2   :  { %v25_v1 = vld [vmem:[%s333_s2 + $0x18] sm:$0xff]  ;;  %v24_v4 = vld [vmem:[%s333_s2 + $0x10] sm:$0xff]  ;;  %216 = vmatpush3.msra.mxu0 %v30_v0  ;;  %v23_v6 = vld [vmem:[%s333_s2 + $0x8] sm:$0xff] }
   0x3   :  { %227 = vmatpush3.msra.mxu1 %v25_v1  ;;  %217 = vmatprep.subr.mxu0 %v262_v2 }
   0x4   :  { %228 = vmatprep.subr.mxu1 %v262_v2 }
   0x5   :  { %10 = vsyncpa [#allocation3], 0  ;;  %218 = vmatpush3.msra.mxu0 %v29_v3  ;;  %229 = vmatpush3.msra.mxu1 %v24_v4  ;;  %v27_v7 = vld [vmem:[%s334_s3] sm:$0xff]  ;;  %vm31_vm0 = vcmask 261120   ;;  %vm263_vm1 = vmmov 0   ;;  %s264_s13 = smov [#allocation2]  }
   0x6   :  { %219 = vmatprep.subr.mxu0 %v262_v2  ;;  %230 = vmatprep.subr.mxu1 %v262_v2  ;;  %v22_v8 = vld [vmem:[%s333_s2] sm:$0xff]  ;;  %vm186_vm2 = vcmask 130048  }
   0x7   :  { %220 = vmatpush3.msra.mxu0 %v28_v5  ;;  %231 = vmatpush3.msra.mxu1 %v23_v6  ;;  %v26_v9 = vld [vmem:[%s332_s1] sm:$0xff]  ;;  %s194_s1 = sshll.u32 %s264_s13, 4  ;;  %s195_s1 = int_to_ptr.vmem [resolvable:$true] %s194_s1 }
   0x8   :  { %221 = vmatprep.subr.mxu0 %v262_v2  ;;  %232 = vmatprep.subr.mxu1 %v262_v2  ;;  %v21_v10 = vld [vmem:[%s331_s0] sm:$0xff]  ;;  %s240_s0 = scalar_lea.vmem %s195_s1, 128  ;;  %p245_p1 = scmp.lt.s32.totalorder %s195_s1, %s195_s1 }
   0x9   :  { %222 = vmatpush3.msra.mxu0 %v27_v7  ;;  %223 = vmatprep.mubr.msk.f32.mxu0 %vm263_vm1, %v262_v2  ;;  %v204_v13 = vld [vmem:[%s335_s4] ss:$0 sm:$0xff]  ;;  %p241_p0 = scmp.ne.s32.totalorder %s195_s1, %s240_s0  ;;  %p246_p2 = scmp.lt.s32.totalorder %s240_s0, %s240_s0 }
   0xa   :  { %233 = vmatpush3.msra.mxu1 %v22_v8  ;;  %234 = vmatprep.mubr.msk.f32.mxu1 %vm263_vm1, %v262_v2 }
   0xb   :  { %224 = vmatmul.mubr.msk.f32.vlgmr.msra.gmra.mxu0 %vm31_vm0, %v26_v9  ;;  %235 = vmatmul.mubr.msk.f32.vlgmr.msra.gmra.mxu1 %vm31_vm0, %v21_v10  ;;  %p247_p3 = por %p246_p2, %p245_p1 }
   0xd   :  { %p248_p4 = pnand %p247_p3, %p241_p0 }
  0xcb   :  { %v101_v11 = vpop.f32.mrf.mxu0  ;;  %v174_v12 = vpop.f32.mrf.mxu1 }
  0xcc   :  { %v175_v14 = vadd.f32 %v174_v12, %v101_v11 }
  0xcd   :  { %v225_v15 = vpop.f32.mrf.mxu0  ;;  %v236_v16 = vpop.f32.mrf.mxu1 }
  0xce   :  { %v185_v17 = vadd.f32 %v204_v13, %v175_v14 }
  0xd0   :  { %187 = vst.msk [vmem:[#allocation2] sm:$0xff] %vm186_vm2, %v185_v17 }
  0xd1   :  { %251 = shalt.err (!%p248_p4)
}
  0xd2   :  { %197 = dma.vmem_to_hbm [thread:$0]  %s195_s1, 128, %s336_s5, [#allocation3]  }
  0xd3   :  { %260 = dma.done.wait [#allocation3], 128  }
  0xd4   :  { %261 = vsyncadd [#allocation3], 4294967168 }
  0xd5   :  { %201 = vsyncpa [#allocation3], 1 }

</bundles_post_ra>
